<compile_context>
chip_gen: v7x
topology: tpu7x:2x2x1
jax: 0.10.0
libtpu: 0.0.40
codegen_flags: <defaults>
</compile_context>

<pallas_src>
import functools

import jax
import jax.numpy as jnp
from jax.experimental import pallas as pl
from jax.experimental.pallas import tpu as pltpu


def _dice_sums_kernel(*refs, hw, tile, apply_softmax, has_mask, needs_tail):
    """Accumulates per-class dice partial sums into resident VMEM scratch.

    score_ref : (C, TILE)  native dtype — per-class scores for TILE pixels
    labels_ref: (1, TILE)  int8/int32   — class labels
    mask_ref  : (1, TILE)  int8         — optional binary keep/drop mask (has_mask)
    inter_out, y_out, z_out : (C, 1) f32 per-batch outputs (written on last tile)
    inter_acc, y_acc, z_acc : (C, TILE) f32 VMEM scratch accumulators
    """
    if has_mask:
        (score_ref, labels_ref, mask_ref,
         inter_out, y_out, z_out,
         inter_acc, y_acc, z_acc) = refs
    else:
        (score_ref, labels_ref,
         inter_out, y_out, z_out,
         inter_acc, y_acc, z_acc) = refs

    j = pl.program_id(1)
    nj = pl.num_programs(1)
    C = score_ref.shape[0]

    @pl.when(j == 0)
    def _init():
        inter_acc[...] = jnp.zeros_like(inter_acc)
        y_acc[...] = jnp.zeros_like(y_acc)
        z_acc[...] = jnp.zeros_like(z_acc)

    def _accumulate(is_tail):
        s = score_ref[...].astype(jnp.float32)            # (C, tile)
        lab = labels_ref[...].astype(jnp.int32)           # (1, tile)

        if apply_softmax:
            # softmax over the class (sublane) axis, per pixel
            s_max = jnp.max(s, axis=0, keepdims=True)
            e = jnp.exp(s - s_max)
            d = jnp.sum(e, axis=0, keepdims=True)         # (1, tile)
            inv = pl.reciprocal(d, approx=True)           # EUP slot (otherwise idle)
            inv = inv * (2.0 - d * inv)                    # one Newton step -> f32 accuracy
            s = e * inv

        # (C,1) sublane iota broadcast against the (1,tile) label row.
        class_ids = jax.lax.broadcasted_iota(jnp.int32, (C, 1), 0)
        hit = lab == class_ids                            # (C, tile) one-hot bool

        if is_tail:
            # Lane validity against the true pixel count (handles Pallas'
            # unspecified edge-block padding). Combined via jnp.where — never
            # multiply — so 0*NaN cannot leak through.
            pix = j * tile + jax.lax.broadcasted_iota(jnp.int32, (1, tile), 1)
            valid = pix < hw                              # (1, tile) bool
            hit = hit & valid

        if has_mask:
            # Binary mask semantics (values {0,1}); selection == multiplication.
            mb = mask_ref[...] != 0                       # (1, tile) bool
            keep = hit & mb
            zkeep = (valid & mb) if is_tail else mb
            inter_acc[...] += jnp.where(keep, s, 0.0)     # sum(score * onehot * mask)
            y_acc[...] += jnp.where(keep, 1.0, 0.0)       # onehot*onehot == onehot
            z_acc[...] += jnp.where(zkeep, s * s, 0.0)    # sum(score^2 * mask)
        else:
            inter_acc[...] += jnp.where(hit, s, 0.0)
            y_acc[...] += jnp.where(hit, 1.0, 0.0)
            if is_tail:
                z_acc[...] += jnp.where(valid, s * s, 0.0)
            else:
                z_acc[...] += s * s

    if needs_tail:
        @pl.when(j < nj - 1)
        def _interior():
            _accumulate(False)                            # fast path, no validity selects

        @pl.when(j == nj - 1)
        def _tail():
            _accumulate(True)                             # only the last tile is ragged
    else:
        _accumulate(False)

    @pl.when(j == nj - 1)
    def _finalize():
        # Cross-lane reduce on the XLU (free here — kernel never touches the MXU);
        # write only a tiny (C, 1) per-batch partial sum back to HBM.
        inter_out[...] = jnp.sum(inter_acc[...], axis=1, keepdims=True)
        y_out[...] = jnp.sum(y_acc[...], axis=1, keepdims=True)
        z_out[...] = jnp.sum(z_acc[...], axis=1, keepdims=True)


def mask_dice_loss(inputs, target, mask=None, weight=None, softmax=False, tile=None):
    """JAX/Pallas equivalent of MaskDiceLoss.forward.

    inputs: (B, C, H, W) float scores (NCHW, like the PyTorch module)
    target: (B, 1, H, W) integer-valued class labels
    mask:   (B, 1, H, W) optional {0,1} pixel mask
    """
    B, C, H, W = inputs.shape
    HW = H * W

    # Natural layout: free reshapes, score streamed in its native dtype.
    score = inputs.reshape(B, C, HW)
    # Sideband streams downcast to 1 B/pixel (was 4 B/pixel => ~25-30% HBM traffic at C=4).
    label_dtype = jnp.int8 if C <= 127 else jnp.int32
    labels = jnp.reshape(target, (B, 1, HW)).astype(label_dtype)
    mvec = None if mask is None else jnp.reshape(mask, (B, 1, HW)).astype(jnp.int8)
    has_mask = mvec is not None

    score_itemsize = jnp.dtype(score.dtype).itemsize
    hw128 = ((HW + 127) // 128) * 128

    # Per-generation VMEM awareness (v5e/v6e: 128 MiB physical, v7x: 64 MiB).
    try:
        vmem_cap = int(pltpu.get_tpu_info().vmem_capacity_bytes)
    except Exception:
        vmem_cap = 64 << 20  # assume the tightest chip (v7x) if the query fails
    budget = min(20 << 20, (3 * vmem_cap) // 8)

    def _vmem_est(t):
        # double-buffered score blocks + sublane-padded (1,t) sideband buffers
        # + three resident f32 accumulators (outputs are tiny, ignored).
        score_b = 2 * C * t * score_itemsize
        side_b = 2 * 32 * t * (2 if has_mask else 1)
        acc_b = 3 * C * t * 4
        return score_b + side_b + acc_b

    if tile is None:
        # Adaptive lane tile: ~4 MiB of score bytes per grid step amortizes the
        # ~0.35us per-step overhead (65536 lanes at C<=8/f32, ~8192 at C>=64).
        t = (4 << 20) // max(1, C * score_itemsize)
        t = max(8192, min(65536, t))
    else:
        t = int(tile)
    t = min(t, hw128)
    t = max(128, (t // 128) * 128)
    while t > 128 and _vmem_est(t) > budget:
        t = max(128, ((t // 2) // 128) * 128)
    tile = t

    num_tiles = pl.cdiv(HW, tile)
    needs_tail = (HW % tile) != 0  # only the last pixel tile can see edge padding

    kernel = functools.partial(
        _dice_sums_kernel, hw=HW, tile=tile, apply_softmax=bool(softmax),
        has_mask=has_mask, needs_tail=needs_tail)

    in_specs = [
        pl.BlockSpec((None, C, tile), lambda b, j: (b, 0, j)),   # score
        pl.BlockSpec((None, 1, tile), lambda b, j: (b, 0, j)),   # labels
    ]
    args = [score, labels]
    if has_mask:
        in_specs.append(pl.BlockSpec((None, 1, tile), lambda b, j: (b, 0, j)))
        args.append(mvec)

    out_shape = jax.ShapeDtypeStruct((B, C, 1), jnp.float32)
    out_spec = pl.BlockSpec((None, C, 1), lambda b, j: (b, 0, 0))

    # TODO(synk): on v7x with B == 1 (or odd B), add a second "parallel" grid axis
    # that splits the pixel range so both TensorCores get work; sum the halves in
    # the wrapper.
    inter_p, y_p, z_p = pl.pallas_call(
        kernel,
        out_shape=(out_shape, out_shape, out_shape),
        grid_spec=pltpu.PrefetchScalarGridSpec(
            num_scalar_prefetch=0,
            grid=(B, num_tiles),
            in_specs=in_specs,
            out_specs=(out_spec, out_spec, out_spec),
            scratch_shapes=[pltpu.VMEM((C, tile), jnp.float32)] * 3,
        ),
        compiler_params=pltpu.CompilerParams(
            dimension_semantics=("parallel", "arbitrary"),
            # Explicit limit: above v5e's 16 MiB scoped default, at v7x's 32 MiB
            # default, well under physical VMEM on every generation.
            vmem_limit_bytes=int(min(32 << 20, vmem_cap // 2)),
        ),
    )(*args)

    intersect = jnp.sum(inter_p[:, :, 0], axis=0)    # (C,)
    y_sum = jnp.sum(y_p[:, :, 0], axis=0)
    z_sum = jnp.sum(z_p[:, :, 0], axis=0)

    if weight is None:
        w = jnp.ones((C,), jnp.float32)
    else:
        w = jnp.asarray(weight, jnp.float32)

    smooth = 1e-10
    dice = 1.0 - (2.0 * intersect + smooth) / (z_sum + y_sum + smooth)
    return jnp.sum(dice * w) / C


def _reference_loss(inputs, target, mask=None, weight=None, softmax=False):
    """Plain-JAX reference matching the PyTorch forward exactly."""
    B, C, H, W = inputs.shape
    s = jax.nn.softmax(inputs, axis=1) if softmax else inputs
    s = s.astype(jnp.float32)
    onehot = (target.astype(jnp.float32) ==
              jnp.arange(C, dtype=jnp.float32)[None, :, None, None]
              ).astype(jnp.float32)                       # (B, C, H, W)
    if mask is None:
        m = jnp.ones((B, 1, H, W), jnp.float32)
    else:
        m = mask.astype(jnp.float32)
    m = jnp.broadcast_to(m, (B, C, H, W))
    if weight is None:
        weight = [1.0] * C
    smooth = 1e-10
    loss = 0.0
    for i in range(C):
        inter = jnp.sum(s[:, i] * onehot[:, i] * m[:, i])
        y = jnp.sum(onehot[:, i] * onehot[:, i] * m[:, i])
        z = jnp.sum(s[:, i] * s[:, i] * m[:, i])
        dice = 1.0 - (2.0 * inter + smooth) / (z + y + smooth)
        loss = loss + dice * weight[i]
    return loss / C


if __name__ == "__main__":
    key = jax.random.PRNGKey(0)
    k1, k2, k3, k4, k5 = jax.random.split(key, 5)

    B, C, H, W = 2, 4, 16, 16
    inputs = jax.random.normal(k1, (B, C, H, W), dtype=jnp.float32)
    target = jax.random.randint(k2, (B, 1, H, W), 0, C).astype(jnp.float32)
    mask = (jax.random.uniform(k3, (B, 1, H, W)) > 0.5).astype(jnp.float32)

    # masked + softmax path
    loss = jax.block_until_ready(mask_dice_loss(inputs, target, mask=mask, softmax=True))
    ref = _reference_loss(inputs, target, mask=mask, softmax=True)

    # unmasked, no-softmax path (inputs as probabilities)
    probs = jax.nn.softmax(inputs, axis=1)
    loss2 = jax.block_until_ready(mask_dice_loss(probs, target))
    ref2 = _reference_loss(probs, target)

    # ragged spatial size (exercises the in-kernel tail-validity path) + weights
    Hr, Wr = 10, 10
    inputs_r = jax.random.normal(k4, (B, C, Hr, Wr), dtype=jnp.float32)
    target_r = jax.random.randint(k5, (B, 1, Hr, Wr), 0, C).astype(jnp.float32)
    loss3 = jax.block_until_ready(
        mask_dice_loss(inputs_r, target_r, weight=[1.0, 2.0, 0.5, 1.5], softmax=True))
    ref3 = _reference_loss(inputs_r, target_r, weight=[1.0, 2.0, 0.5, 1.5], softmax=True)

    assert jnp.allclose(loss, ref, rtol=1e-4, atol=1e-5), (loss, ref)
    assert jnp.allclose(loss2, ref2, rtol=1e-4, atol=1e-5), (loss2, ref2)
    assert jnp.allclose(loss3, ref3, rtol=1e-4, atol=1e-5), (loss3, ref3)
    print("KERNEL_OK")
</pallas_src>

<mosaic_0001>
module attributes {stable_mosaic.version = 11 : i64} {
  func.func @_dice_sums_kernel(%arg0: i32, %arg1: i32, %arg2: memref<1x4x256xf32, #tpu.memory_space<vmem>>, %arg3: memref<1x1x256xi8, #tpu.memory_space<vmem>>, %arg4: memref<1x1x256xi8, #tpu.memory_space<vmem>>, %arg5: memref<1x4x1xf32, #tpu.memory_space<vmem>>, %arg6: memref<1x4x1xf32, #tpu.memory_space<vmem>>, %arg7: memref<1x4x1xf32, #tpu.memory_space<vmem>>, %arg8: memref<4x256xf32, #tpu.memory_space<vmem>>, %arg9: memref<4x256xf32, #tpu.memory_space<vmem>>, %arg10: memref<4x256xf32, #tpu.memory_space<vmem>>) attributes {dimension_semantics = [#tpu.dimension_semantics<parallel>, #tpu.dimension_semantics<arbitrary>], iteration_bounds = array<i64: 2, 1>, scalar_prefetch = 0 : i64, scratch_operands = 3 : i64, tpu.core_type = #tpu.core_type<tc>, window_params = [{transform_indices = @transform_0, window_bounds = array<i64: 1, 4, 256>}, {transform_indices = @transform_1, window_bounds = array<i64: 1, 1, 256>}, {transform_indices = @transform_2, window_bounds = array<i64: 1, 1, 256>}, {transform_indices = @transform_3, window_bounds = array<i64: 1, 4, 1>}, {transform_indices = @transform_4, window_bounds = array<i64: 1, 4, 1>}, {transform_indices = @transform_5, window_bounds = array<i64: 1, 4, 1>}]} {
    %c0_i32 = arith.constant 0 : i32
    %0 = arith.cmpi eq, %arg1, %c0_i32 : i32
    %1 = arith.extui %0 : i1 to i32
    %c0_i32_0 = arith.constant 0 : i32
    %2 = arith.cmpi ne, %1, %c0_i32_0 : i32
    scf.if %2 {
      %cst_29 = arith.constant 0.000000e+00 : f32
      %54 = vector.broadcast %cst_29 : f32 to vector<4x256xf32>
      %c0_30 = arith.constant 0 : index
      %c0_31 = arith.constant 0 : index
      %55 = vector.load %arg8[%c0_30, %c0_31] : memref<4x256xf32, #tpu.memory_space<vmem>>, vector<4x256xf32>
      tpu.vector_store %arg8[%c0_30, %c0_31], %54 {strides = array<i32>} : memref<4x256xf32, #tpu.memory_space<vmem>>, vector<4x256xf32>,
      %cst_32 = arith.constant 0.000000e+00 : f32
      %56 = vector.broadcast %cst_32 : f32 to vector<4x256xf32>
      %c0_33 = arith.constant 0 : index
      %c0_34 = arith.constant 0 : index
      %57 = vector.load %arg9[%c0_33, %c0_34] : memref<4x256xf32, #tpu.memory_space<vmem>>, vector<4x256xf32>
      tpu.vector_store %arg9[%c0_33, %c0_34], %56 {strides = array<i32>} : memref<4x256xf32, #tpu.memory_space<vmem>>, vector<4x256xf32>,
      %cst_35 = arith.constant 0.000000e+00 : f32
      %58 = vector.broadcast %cst_35 : f32 to vector<4x256xf32>
      %c0_36 = arith.constant 0 : index
      %c0_37 = arith.constant 0 : index
      %59 = vector.load %arg10[%c0_36, %c0_37] : memref<4x256xf32, #tpu.memory_space<vmem>>, vector<4x256xf32>
      tpu.vector_store %arg10[%c0_36, %c0_37], %58 {strides = array<i32>} : memref<4x256xf32, #tpu.memory_space<vmem>>, vector<4x256xf32>,
    } else {
    }
    %c0 = arith.constant 0 : index
    %c0_1 = arith.constant 0 : index
    %c0_2 = arith.constant 0 : index
    %3 = vector.load %arg2[%c0, %c0_1, %c0_2] : memref<1x4x256xf32, #tpu.memory_space<vmem>>, vector<1x4x256xf32>
    %4 = vector.shape_cast %3 : vector<1x4x256xf32> to vector<4x256xf32>
    %c0_3 = arith.constant 0 : index
    %c0_4 = arith.constant 0 : index
    %c0_5 = arith.constant 0 : index
    %5 = vector.load %arg3[%c0_3, %c0_4, %c0_5] : memref<1x1x256xi8, #tpu.memory_space<vmem>>, vector<1x1x256xi8>
    %6 = vector.shape_cast %5 : vector<1x1x256xi8> to vector<1x256xi8>
    %7 = arith.extsi %6 : vector<1x256xi8> to vector<1x256xi32>
    %cst = arith.constant dense<0xFF800000> : vector<256xf32>
    %8 = vector.multi_reduction <maximumf>, %4, %cst [0] : vector<4x256xf32> to vector<256xf32>
    %9 = vector.shape_cast %8 : vector<256xf32> to vector<1x256xf32>
    %10 = vector.broadcast %9 : vector<1x256xf32> to vector<4x256xf32>
    %11 = arith.subf %4, %10 : vector<4x256xf32>
    %12 = math.exp %11 : vector<4x256xf32>
    %cst_6 = arith.constant dense<0.000000e+00> : vector<256xf32>
    %13 = vector.multi_reduction <add>, %12, %cst_6 [0] : vector<4x256xf32> to vector<256xf32>
    %14 = vector.shape_cast %13 : vector<256xf32> to vector<1x256xf32>
    %15 = tpu.reciprocal %14 {approx = true} : vector<1x256xf32> -> vector<1x256xf32>
    %16 = arith.mulf %14, %15 : vector<1x256xf32>
    %cst_7 = arith.constant 2.000000e+00 : f32
    %17 = vector.broadcast %cst_7 : f32 to vector<1x256xf32>
    %18 = arith.subf %17, %16 : vector<1x256xf32>
    %19 = arith.mulf %15, %18 : vector<1x256xf32>
    %20 = vector.broadcast %19 : vector<1x256xf32> to vector<4x256xf32>
    %21 = arith.mulf %12, %20 : vector<4x256xf32>
    %22 = tpu.iota {dimensions = array<i32: 0>} : vector<4x1xi32>
    %23 = vector.broadcast %7 : vector<1x256xi32> to vector<4x256xi32>
    %24 = vector.broadcast %22 : vector<4x1xi32> to vector<4x256xi32>
    %25 = arith.cmpi eq, %23, %24 : vector<4x256xi32>
    %c0_8 = arith.constant 0 : index
    %c0_9 = arith.constant 0 : index
    %c0_10 = arith.constant 0 : index
    %26 = vector.load %arg4[%c0_8, %c0_9, %c0_10] : memref<1x1x256xi8, #tpu.memory_space<vmem>>, vector<1x1x256xi8>
    %27 = vector.shape_cast %26 : vector<1x1x256xi8> to vector<1x256xi8>
    %c0_i8 = arith.constant 0 : i8
    %28 = vector.broadcast %c0_i8 : i8 to vector<1x256xi8>
    %29 = arith.cmpi ne, %27, %28 : vector<1x256xi8>
    %30 = vector.broadcast %29 : vector<1x256xi1> to vector<4x256xi1>
    %31 = arith.andi %25, %30 : vector<4x256xi1>
    %c0_11 = arith.constant 0 : index
    %c0_12 = arith.constant 0 : index
    %32 = vector.load %arg8[%c0_11, %c0_12] : memref<4x256xf32, #tpu.memory_space<vmem>>, vector<4x256xf32>
    %cst_13 = arith.constant 0.000000e+00 : f32
    %33 = vector.broadcast %cst_13 : f32 to vector<4x256xf32>
    %34 = arith.select %31, %21, %33 : vector<4x256xi1>, vector<4x256xf32>
    %35 = arith.addf %32, %34 : vector<4x256xf32>
    %c0_14 = arith.constant 0 : index
    %c0_15 = arith.constant 0 : index
    %36 = vector.load %arg8[%c0_14, %c0_15] : memref<4x256xf32, #tpu.memory_space<vmem>>, vector<4x256xf32>
    tpu.vector_store %arg8[%c0_14, %c0_15], %35 {strides = array<i32>} : memref<4x256xf32, #tpu.memory_space<vmem>>, vector<4x256xf32>,
    %c0_16 = arith.constant 0 : index
    %c0_17 = arith.constant 0 : index
    %37 = vector.load %arg9[%c0_16, %c0_17] : memref<4x256xf32, #tpu.memory_space<vmem>>, vector<4x256xf32>
    %cst_18 = arith.constant 1.000000e+00 : f32
    %cst_19 = arith.constant 0.000000e+00 : f32
    %38 = vector.broadcast %cst_18 : f32 to vector<4x256xf32>
    %39 = vector.broadcast %cst_19 : f32 to vector<4x256xf32>
    %40 = arith.select %31, %38, %39 : vector<4x256xi1>, vector<4x256xf32>
    %41 = arith.addf %37, %40 : vector<4x256xf32>
    %c0_20 = arith.constant 0 : index
    %c0_21 = arith.constant 0 : index
    %42 = vector.load %arg9[%c0_20, %c0_21] : memref<4x256xf32, #tpu.memory_space<vmem>>, vector<4x256xf32>
    tpu.vector_store %arg9[%c0_20, %c0_21], %41 {strides = array<i32>} : memref<4x256xf32, #tpu.memory_space<vmem>>, vector<4x256xf32>,
    %c0_22 = arith.constant 0 : index
    %c0_23 = arith.constant 0 : index
    %43 = vector.load %arg10[%c0_22, %c0_23] : memref<4x256xf32, #tpu.memory_space<vmem>>, vector<4x256xf32>
    %44 = arith.mulf %21, %21 : vector<4x256xf32>
    %cst_24 = arith.constant 0.000000e+00 : f32
    %45 = vector.shape_cast %29 : vector<1x256xi1> to vector<1x256xi1>
    %46 = vector.broadcast %45 : vector<1x256xi1> to vector<4x256xi1>
    %47 = vector.broadcast %cst_24 : f32 to vector<4x256xf32>
    %48 = arith.select %46, %44, %47 : vector<4x256xi1>, vector<4x256xf32>
    %49 = arith.addf %43, %48 : vector<4x256xf32>
    %c0_25 = arith.constant 0 : index
    %c0_26 = arith.constant 0 : index
    %50 = vector.load %arg10[%c0_25, %c0_26] : memref<4x256xf32, #tpu.memory_space<vmem>>, vector<4x256xf32>
    tpu.vector_store %arg10[%c0_25, %c0_26], %49 {strides = array<i32>} : memref<4x256xf32, #tpu.memory_space<vmem>>, vector<4x256xf32>,
    %c0_i32_27 = arith.constant 0 : i32
    %51 = arith.cmpi eq, %arg1, %c0_i32_27 : i32
    %52 = arith.extui %51 : i1 to i32
    %c0_i32_28 = arith.constant 0 : i32
    %53 = arith.cmpi ne, %52, %c0_i32_28 : i32
    scf.if %53 {
      %c0_29 = arith.constant 0 : index
      %c0_30 = arith.constant 0 : index
      %54 = vector.load %arg8[%c0_29, %c0_30] : memref<4x256xf32, #tpu.memory_space<vmem>>, vector<4x256xf32>
      %cst_31 = arith.constant dense<0.000000e+00> : vector<4xf32>
      %55 = vector.multi_reduction <add>, %54, %cst_31 [1] : vector<4x256xf32> to vector<4xf32>
      %56 = vector.shape_cast %55 : vector<4xf32> to vector<4x1xf32>
      %c0_32 = arith.constant 0 : index
      %c0_33 = arith.constant 0 : index
      %c0_34 = arith.constant 0 : index
      %57 = vector.load %arg5[%c0_32, %c0_33, %c0_34] : memref<1x4x1xf32, #tpu.memory_space<vmem>>, vector<1x4x1xf32>
      %58 = vector.shape_cast %57 : vector<1x4x1xf32> to vector<4x1xf32>
      %59 = vector.shape_cast %56 : vector<4x1xf32> to vector<1x4x1xf32>
      tpu.vector_store %arg5[%c0_32, %c0_33, %c0_34], %59 {strides = array<i32>} : memref<1x4x1xf32, #tpu.memory_space<vmem>>, vector<1x4x1xf32>,
      %c0_35 = arith.constant 0 : index
      %c0_36 = arith.constant 0 : index
      %60 = vector.load %arg9[%c0_35, %c0_36] : memref<4x256xf32, #tpu.memory_space<vmem>>, vector<4x256xf32>
      %cst_37 = arith.constant dense<0.000000e+00> : vector<4xf32>
      %61 = vector.multi_reduction <add>, %60, %cst_37 [1] : vector<4x256xf32> to vector<4xf32>
      %62 = vector.shape_cast %61 : vector<4xf32> to vector<4x1xf32>
      %c0_38 = arith.constant 0 : index
      %c0_39 = arith.constant 0 : index
      %c0_40 = arith.constant 0 : index
      %63 = vector.load %arg6[%c0_38, %c0_39, %c0_40] : memref<1x4x1xf32, #tpu.memory_space<vmem>>, vector<1x4x1xf32>
      %64 = vector.shape_cast %63 : vector<1x4x1xf32> to vector<4x1xf32>
      %65 = vector.shape_cast %62 : vector<4x1xf32> to vector<1x4x1xf32>
      tpu.vector_store %arg6[%c0_38, %c0_39, %c0_40], %65 {strides = array<i32>} : memref<1x4x1xf32, #tpu.memory_space<vmem>>, vector<1x4x1xf32>,
      %c0_41 = arith.constant 0 : index
      %c0_42 = arith.constant 0 : index
      %66 = vector.load %arg10[%c0_41, %c0_42] : memref<4x256xf32, #tpu.memory_space<vmem>>, vector<4x256xf32>
      %cst_43 = arith.constant dense<0.000000e+00> : vector<4xf32>
      %67 = vector.multi_reduction <add>, %66, %cst_43 [1] : vector<4x256xf32> to vector<4xf32>
      %68 = vector.shape_cast %67 : vector<4xf32> to vector<4x1xf32>
      %c0_44 = arith.constant 0 : index
      %c0_45 = arith.constant 0 : index
      %c0_46 = arith.constant 0 : index
      %69 = vector.load %arg7[%c0_44, %c0_45, %c0_46] : memref<1x4x1xf32, #tpu.memory_space<vmem>>, vector<1x4x1xf32>
      %70 = vector.shape_cast %69 : vector<1x4x1xf32> to vector<4x1xf32>
      %71 = vector.shape_cast %68 : vector<4x1xf32> to vector<1x4x1xf32>
      tpu.vector_store %arg7[%c0_44, %c0_45, %c0_46], %71 {strides = array<i32>} : memref<1x4x1xf32, #tpu.memory_space<vmem>>, vector<1x4x1xf32>,
    } else {
    }
    return
  }
  func.func @transform_0(%arg0: i32, %arg1: i32) -> (i32, i32, i32) {
    %c0_i32 = arith.constant 0 : i32
    %c0_i32_0 = arith.constant 0 : i32
    return %arg0, %c0_i32, %arg1 : i32, i32, i32
  }
  func.func @transform_1(%arg0: i32, %arg1: i32) -> (i32, i32, i32) {
    %c0_i32 = arith.constant 0 : i32
    %c0_i32_0 = arith.constant 0 : i32
    return %arg0, %c0_i32, %arg1 : i32, i32, i32
  }
  func.func @transform_2(%arg0: i32, %arg1: i32) -> (i32, i32, i32) {
    %c0_i32 = arith.constant 0 : i32
    %c0_i32_0 = arith.constant 0 : i32
    return %arg0, %c0_i32, %arg1 : i32, i32, i32
  }
  func.func @transform_3(%arg0: i32, %arg1: i32) -> (i32, i32, i32) {
    %c0_i32 = arith.constant 0 : i32
    %c0_i32_0 = arith.constant 0 : i32
    %c0_i32_1 = arith.constant 0 : i32
    return %arg0, %c0_i32, %c0_i32_0 : i32, i32, i32
  }
  func.func @transform_4(%arg0: i32, %arg1: i32) -> (i32, i32, i32) {
    %c0_i32 = arith.constant 0 : i32
    %c0_i32_0 = arith.constant 0 : i32
    %c0_i32_1 = arith.constant 0 : i32
    return %arg0, %c0_i32, %c0_i32_0 : i32, i32, i32
  }
  func.func @transform_5(%arg0: i32, %arg1: i32) -> (i32, i32, i32) {
    %c0_i32 = arith.constant 0 : i32
    %c0_i32_0 = arith.constant 0 : i32
    %c0_i32_1 = arith.constant 0 : i32
    return %arg0, %c0_i32, %c0_i32_0 : i32, i32, i32
  }
}

</mosaic_0001>

<bundles_post_ra>
// kernel: tpu_custom_call.1
= control target key start
LH: loop header
LB: loop body
LE: loop exit
PB: predicated region body
PF: predicated region fallthrough
CT: control target
= control target key end

     0   :  { %11 = vsyncpa [#allocation6], 0  ;;  %s1076_s0 = inlined_call_operand.hbm [shape: f32[2,4,256], index: 0, kind: input, shape index: {}]   ;;  %s1077_s1 = inlined_call_operand.vmem [shape: s8[2,1,256], index: 1, kind: input, shape index: {}]   ;;  %s1078_s2 = inlined_call_operand.vmem [shape: s8[2,1,256], index: 2, kind: input, shape index: {}]   ;;  %s1079_s3 = inlined_call_operand.vmem [shape: f32[2,4,1], index: 3, kind: output, shape index: {0}]   ;;  %s1080_s4 = inlined_call_operand.vmem [shape: f32[2,4,1], index: 4, kind: output, shape index: {1}]   ;;  %s1081_s5 = inlined_call_operand.vmem [shape: f32[2,4,1], index: 5, kind: output, shape index: {2}]  }
   0x1   :  { %13 = vsyncpa [#allocation6 + $0x1], 0  ;;  %s897_s18 = smov 0   ;;  %s899_s19 = smov 0  }
   0x2   :  { %s901_s20 = smov 0   ;;  %s903_s21 = smov 0  }
   0x3   :  { %s905_s22 = smov 0   ;;  %s907_s23 = smov 0  }
   0x4 LB: > { %s698_s24 = sadd.s32 4294967295, %s862_s23   ;;  %s31_s25 = sadd.s32 1, %s858_s22  ;;  %s862_s23 = sphi %s907_s23, %s19_s23   ;;  %s858_s22 = sphi %s905_s22, %s1099_s22   ;;  %s854_s21 = sphi %s903_s21, %s1098_s21   ;;  %s850_s20 = sphi %s901_s20, %s1097_s20   ;;  %s846_s19 = sphi %s899_s19, %s1096_s19   ;;  %s842_s18 = sphi %s897_s18, %s1095_s18  }
   0x5   : > { %p33_p0 = scmp.ge.s32.totalorder %s31_s25, 2  ;;  %s40_s26 = sadd.s32 1, %s850_s20 }
   0x6   : > { %p47_p1 = scmp.ne.s32.totalorder %s850_s20, %s846_s19  ;;  %p48_p2 = scmp.eq.s32.totalorder %s862_s23, 0 }
   0x7   : > { %s1101_s25 = smov (%p33_p0, %s31_s25), 0  ;;  %p53_p4 = scmp.ne.s32.totalorder %s846_s19, %s842_s18 }
   0x8   : > { %p933_p3 = por %p48_p2, %p47_p1  ;;  %s35_s28 = ssub.s32 %s858_s22, %s1101_s25 }
   0x9   : > { %p54_p5 = scmp.eq.s32.totalorder %s698_s24, 0  ;;  %p38_p6 = scmp.eq.s32.totalorder %s35_s28, 0 }
   0xa   : > { %p724_p8 = scmp.lt.s32.totalorder %s862_s23, 2  ;;  %s211_s6 = sand.u32 1, %s850_s20  }
   0xb   : > { %p940_p7 = por %p54_p5, %p53_p4  ;;  %s714_s7 = sshll.u32 %s858_s22, 7 }
   0xc   : > { %s946_s30 = scalar_select %p38_p6, %s850_s20, %s40_s26  }
   0xd   : > { %s702_s8 = sshll.u32 %s211_s6, 3  ;;  %s953_s11 = scalar_lea.hbm %s1076_s0, %s714_s7 }
   0xe   : > { %s215_s12 = scalar_lea.vmem [#allocation5], %s702_s8  ;;  %p957_p9 = pnand %p724_p8, %p933_p3 }
   0xf   : > { %s225_s13 = sshll.u32 %s215_s12, 4  ;;  %s212_s15 = scalar_lea.sflag [#allocation6], %s211_s6  ;;  %s961_s13 = int_to_ptr.vmem [resolvable:$true] %s225_s13 }
  0x10   : > { %s782_s16 = scalar_lea.hbm %s953_s11, 128  ;;  %p784_p13 = pneg %p957_p9 }
  0x11   : > { %p783_p12 = scmp.ne.s32.totalorder %s953_s11, %s782_s16  ;;  %s787_s24 = scalar_lea.hbm %s1076_s0, 256 }
  0x12   : > { %p788_p2 = scmp.lt.u32.totalorder %s953_s11, %s1076_s0  ;;  %p789_p3 = scmp.lt.u32.totalorder %s787_s24, %s782_s16 }
  0x13   : > { %p785_p0 = pnand %p784_p13, %p783_p12  ;;  %p791_p5 = scmp.lt.u32.totalorder %s782_s16, %s953_s11 }
  0x14   : > { %p790_p4 = por %p789_p3, %p788_p2 }
  0x15   : > { %p786_p1 = pneg %p785_p0 }
  0x16   : > { %p792_p6 = por %p791_p5, %p790_p4 }
  0x18   : > { %p793_p8 = pnand %p792_p6, %p786_p1 }
  0x1a   : > { %796 = shalt.err (!%p793_p8)
}
  0x1b   : > { %s797_s28 = scalar_lea.vmem %s961_s13, 128  ;;  %s864_s6 = smov [#allocation5]  }
  0x1c   : > { %p798_p12 = scmp.ne.s32.totalorder %s961_s13, %s797_s28  ;;  %s802_s7 = sshll.u32 %s864_s6, 4  ;;  %s803_s7 = int_to_ptr.vmem [resolvable:$false] %s802_s7 }
  0x1d   : > { %s804_s8 = scalar_lea.vmem %s803_s7, 256  ;;  %p805_p11 = scmp.lt.s32.totalorder %s961_s13, %s803_s7 }
  0x1e   : > { %p800_p0 = pnand %p798_p12, %p784_p13  ;;  %p806_p2 = scmp.lt.s32.totalorder %s804_s8, %s797_s28 }
  0x20   : > { %p801_p10 = pneg %p800_p0  ;;  %p807_p3 = por %p806_p2, %p805_p11 }
  0x22   : > { %p808_p4 = pnand %p807_p3, %p801_p10 }
  0x24   : > { %811 = shalt.err (!%p808_p4)
}
  0x25   : > { %723 = dma.hbm_to_vmem [thread:$0]  (!%p957_p9), %s953_s11, 128, %s961_s13, %s212_s15  }
  0x26   : > { %p1085_p1 = scmp.lt.s32.totalorder %s862_s23, 3  ;;  %p1086_p5 = scmp.ge.s32.totalorder %s862_s23, 1 }
  0x28   : > { %p255_p13 = pnand %p1086_p5, %p1085_p1 }
  0x29   : > { %s260_s9 = sand.u32 (!%p255_p13), 1, %s846_s19  }
  0x2a   : > { %258 = sbr.rel (%p255_p13) target bundleno = 274 (0x112), region = 32  ;;  %s706_s10 = sshll.u32 (!%p255_p13), %s260_s9, 3 }
  0x2b   : > { %s261_s12 = scalar_lea.sflag (!%p255_p13), [#allocation6], %s260_s9  ;;  %s264_s16 = scalar_lea.vmem (!%p255_p13), [#allocation5], %s706_s10 }
  0x31   : > { %837 = dma.done.wait (%p940_p7), %s261_s12, 128  }
  0x32   : > { %839 = vsyncadd (%p940_p7), %s261_s12, 4294967168  ;;  %vm360_vm0 = vcmask 1043456   ;;  %v354_v0 = vld [vmem:[%s264_s16] sm:$0xff]  ;;  %p316_p7 = scmp.lt.s32.totalorder %s854_s21, 1  ;;  %v865_v23 = vmov 0   ;;  %v412_v26 = vlaneseq  ;;  %vm508_vm11 = vcmask 3072  }
  0x33   : > { %v358_v1 = vcombine.high %v354_v0, %v354_v0  ;;  %v361_v2 = vsel %vm360_vm0, %v354_v0, -inf }
  0x34   : > { %v362_v3 = vrot.slane %v361_v2, 4  ;;  %s1103_s21 = smov (!%p316_p7, %s854_s21), 1  ;;  %v413_v33 = vshrl.u32 %v412_v26, 7 }
  0x35   : > { %v368_v4 = vsel %vm360_vm0, %v358_v1, -inf  ;;  %s707_s29 = sshll.u32 %s1103_s21, 1  ;;  %s709_s24 = sshll.u32 %s1103_s21, 2 }
  0x36   : > { %v363_v5 = vmax.f32 %v361_v2, %v362_v3  ;;  %v369_v6 = vrot.slane %v368_v4, 4  ;;  %s331_s14 = scalar_lea.vmem %s1078_s2, %s707_s29  ;;  %s322_s18 = scalar_lea.vmem %s1077_s1, %s707_s29  ;;  %v416_v38 = vsub.s32 0, %v413_v33  ;;  %v420_v39 = vsub.s32 4, %v413_v33 }
  0x37   : > { %v432_v19 = vld [vmem:[%s331_s14] sm:$0x3]  ;;  %s336_s28 = scalar_lea.vmem %s1079_s3, %s709_s24  ;;  %s344_s8 = scalar_lea.vmem %s1081_s5, %s709_s24 }
  0x38   : > { %v364_v7 = vrot.slane %v363_v5, 2  ;;  %v370_v8 = vmax.f32 %v368_v4, %v369_v6  ;;  %vm433_vm1 = vnez %v432_v19  ;;  %v355_v43 = vld [vmem:[%s322_s18] sm:$0x3]  ;;  %s340_s12 = scalar_lea.vmem %s1080_s4, %s709_s24 }
  0x39   : > { %v434_v24 = vsel %vm433_vm1, 16843009, %v865_v23  ;;  %v356_v47 = vunpack.c.0.s8 %v355_v43 }
  0x3a   : > { %v365_v9 = vmax.f32 %v363_v5, %v364_v7  ;;  %v371_v10 = vrot.slane %v370_v8, 2  ;;  %v435_v30 = vunpack.c.0.s8 %v434_v24  ;;  %v866_v5 = vmov 0.0  }
  0x3b   : > { %v417_v48 = vrot.slane %v356_v47, %v416_v38  ;;  %v421_v49 = vrot.slane %v356_v47, %v420_v39 }
  0x3c   : > { %v366_v11 = vrot.slane %v365_v9, 1  ;;  %v372_v12 = vmax.f32 %v370_v8, %v371_v10  ;;  %vm436_vm2 = vcmp.ne.s32.totalorder %v435_v30, 0 }
  0x3d   : > { %v437_v40 = vsel %vm436_vm2, 1, %v865_v23  ;;  %v425_v53 = vrot.slane %v417_v48, %v416_v38  ;;  %v429_v56 = vrot.slane %v421_v49, %v416_v38 }
  0x3e   : > { %v367_v13 = vmax.f32 %v365_v9, %v366_v11  ;;  %v373_v14 = vrot.slane %v372_v12, 1  ;;  %v441_v45 = vrot.slane %v437_v40, %v416_v38  ;;  %v445_v46 = vrot.slane %v437_v40, %v420_v39 }
  0x3f   : > { %vm1014_vm5 = vcmp.eq.s32.totalorder %v425_v53, %v413_v33  ;;  %vm1022_vm7 = vcmp.eq.s32.totalorder %v429_v56, %v413_v33 }
  0x40   : > { %v374_v15 = vmax.f32 %v372_v12, %v373_v14  ;;  %vm446_vm3 = vcmp.ne.s32.totalorder %v441_v45, 0  ;;  %vm447_vm4 = vcmp.ne.s32.totalorder %v445_v46, 0 }
  0x41   : > { %v448_v50 = vsel %vm446_vm3, 1, %v865_v23  ;;  %v449_v51 = vsel %vm447_vm4, 1, %v865_v23 }
  0x42   : > { %v377_v16 = vcombine.low %v367_v13, %v374_v15  ;;  %v453_v54 = vrot.slane %v448_v50, %v416_v38  ;;  %v457_v57 = vrot.slane %v449_v51, %v416_v38 }
  0x44   : > { %v379_v17 = vsub.f32 %v354_v0, %v377_v16  ;;  %vm1018_vm6 = vcmp.eq.s32.totalorder %v453_v54, 1  ;;  %vm1026_vm8 = vcmp.eq.s32.totalorder %v457_v57, 1 }
  0x45   : > { %vm460_vm9 = vmand %vm1014_vm5, %vm1018_vm6 }
  0x46   : > { %v380_v18 = vmul.f32 1.442695, %v379_v17  ;;  %vm461_vm10 = vmand %vm1022_vm7, %vm1026_vm8  ;;  %v475_v6 = vsel %vm460_vm9, 1.0, %v866_v5 }
  0x47   : > { %v476_v7 = vsel %vm461_vm10, 1.0, %v866_v5 }
  0x48   : > { %776 = vpow2.f32 %v380_v18  ;;  %v479_v9 = vcombine.low %v475_v6, %v476_v7  ;;  %v716_v13 = vcombine.low %v476_v7, %v476_v7 }
  0x52   : > { %v777_v20 = vpop.eup %776 }
  0x53   : > { %v383_v21 = vcombine.high %v777_v20, %v777_v20  ;;  %v385_v22 = vsel %vm360_vm0, %v777_v20, 0.0 }
  0x54   : > { %v386_v25 = vrot.slane %v385_v22, 4 }
  0x55   : > { %v392_v27 = vsel %vm360_vm0, %v383_v21, 0.0  ;;  %v514_v21 = vsel %vm360_vm0, %v479_v9, 0.0 }
  0x56   : > { %v387_v28 = vadd.f32 %v386_v25, %v385_v22  ;;  %v393_v29 = vrot.slane %v392_v27, 4 }
  0x58   : > { %v388_v31 = vrot.slane %v387_v28, 2  ;;  %v394_v32 = vadd.f32 %v393_v29, %v392_v27 }
  0x5a   : > { %v389_v34 = vadd.f32 %v388_v31, %v387_v28  ;;  %v395_v35 = vrot.slane %v394_v32, 2 }
  0x5c   : > { %v390_v36 = vrot.slane %v389_v34, 1  ;;  %v396_v37 = vadd.f32 %v395_v35, %v394_v32 }
  0x5e   : > { %v391_v41 = vadd.f32 %v390_v36, %v389_v34  ;;  %v397_v42 = vrot.slane %v396_v37, 1 }
  0x60   : > { %v398_v44 = vadd.f32 %v397_v42, %v396_v37  ;;  %778 = vrcp.f32 %v391_v41 }
  0x62   : > { %780 = vrcp.f32 %v398_v44 }
  0x6a   : > { %v779_v52 = vpop.eup %778 }
  0x6b   : > { %v401_v55 = vmul.f32 %v779_v52, %v391_v41 }
  0x6c   : > { %v781_v58 = vpop.eup %780 }
  0x6d   : > { %v402_v59 = vmul.f32 %v781_v58, %v398_v44  ;;  %v403_v60 = vsub.f32 2.0, %v401_v55 }
  0x6f   : > { %v404_v63 = vsub.f32 2.0, %v402_v59  ;;  %v405_v0 = vmul.f32 %v779_v52, %v403_v60 }
  0x71   : > { %v406_v3 = vmul.f32 %v781_v58, %v404_v63 }
  0x73   : > { %v409_v4 = vcombine.low %v405_v0, %v406_v3 }
  0x75   : > { %v411_v8 = vmul.f32 %v777_v20, %v409_v4  ;;  %v515_v20 = vsel %vm360_vm0, %v716_v13, 0.0 }
  0x76   : > { %v516_v30 = vadd.f32 %v515_v20, %v514_v21 }
  0x77   : > { %v464_v10 = vcombine.high %v411_v8, %v411_v8  ;;  %v466_v11 = vsel %vm460_vm9, %v411_v8, 0.0  ;;  %v484_v12 = vmul.f32 %v411_v8, %v411_v8 }
  0x79   : > { %v467_v14 = vsel %vm461_vm10, %v464_v10, 0.0  ;;  %v486_v15 = vcombine.high %v484_v12, %v484_v12  ;;  %v488_v16 = vsel %vm1018_vm6, %v484_v12, 0.0 }
  0x7a   : > { %v470_v17 = vcombine.low %v466_v11, %v467_v14  ;;  %v715_v18 = vcombine.low %v467_v14, %v467_v14 }
  0x7b   : > { %v489_v19 = vsel %vm1026_vm8, %v486_v15, 0.0 }
  0x7c   : > { %v503_v22 = vsel %vm360_vm0, %v470_v17, 0.0  ;;  %v504_v23 = vsel %vm360_vm0, %v715_v18, 0.0  ;;  %v492_v24 = vcombine.low %v488_v16, %v489_v19  ;;  %v717_v25 = vcombine.low %v489_v19, %v489_v19 }
  0x7d   : > { %v505_v26 = vadd.f32 %v504_v23, %v503_v22 }
  0x7e   : > { %v524_v27 = vsel %vm360_vm0, %v492_v24, 0.0  ;;  %v525_v28 = vsel %vm360_vm0, %v717_v25, 0.0 }
  0x7f   : > { %506 = vadd.xlane.f32.xlu0 %v505_v26  ;;  %v526_v29 = vadd.f32 %v525_v28, %v524_v27 }
  0x81   : > { %527 = vadd.xlane.f32.xlu1 %v526_v29 }
  0x83   : > { %517 = vadd.xlane.f32.xlu0 %v516_v30 }
 0x10c   : > { %v507_v31 = vpop.xlane.xlu0 %506 }
 0x10d   : > { %509 = vst.msk [vmem:[%s336_s28] sm:$0xf] %vm508_vm11, %v507_v31 }
 0x10e   : > { %v528_v32 = vpop.xlane.xlu1 %527 }
 0x10f   : > { %529 = vst.msk [vmem:[%s344_s8] sm:$0xf] %vm508_vm11, %v528_v32 }
 0x110   : > { %v518_v33 = vpop.xlane.xlu0 %517 }
 0x111   : > { %519 = vst.msk [vmem:[%s340_s12] sm:$0xf] %vm508_vm11, %v518_v33 }
 0x112 PF: > { %s19_s23 = sadd.s32 1, %s862_s23   ;;  %s1095_s18 = smov %s846_s19 }
 0x113   : > { %p16_p9 = scmp.ge.s32.totalorder %s19_s23, 4   ;;  %s1096_s19 = smov %s850_s20 }
 0x114   : > { %s1097_s20 = smov %s946_s30  ;;  %s1098_s21 = smov %s858_s22 }
 0x115   : > { %s1099_s22 = smov %s1101_s25  ;;  %18 = sbr.rel (!%p16_p9) target bundleno = 4 (0x4), region = 110 }
 0x11c   :  { %577 = vsyncpa [#allocation6], 1 }
 0x11d   :  { %579 = vsyncpa [#allocation6 + $0x1], 1 }

</bundles_post_ra>
